<compile_context>
chip_gen: v6e
topology: v6e:2x2x1
jax: 0.10.0
libtpu: 0.0.40
codegen_flags: <defaults>
</compile_context>

<pallas_src>
import math
import jax
import jax.numpy as jnp
from jax.experimental import pallas as pl
from jax.experimental.pallas import tpu as pltpu

_LANE = 128
# Fits v7x's 64 MiB physical VMEM with headroom; plenty for v5e/v6e too.
_VMEM_LIMIT_BYTES = 48 * 1024 * 1024


def _round_up(x, m):
    return ((x + m - 1) // m) * m


def _support_kernel(x_ref, w_ref, o_ref):
    # x_ref: (tm, F_in_p)       compute dtype
    # w_ref: (F_in_p, F_out_p)  compute dtype
    # o_ref: (tm, F_out_p)      compute dtype
    o_ref[...] = jnp.dot(
        x_ref[...], w_ref[...], preferred_element_type=jnp.float32
    ).astype(o_ref.dtype)


def _aggregate_kernel(adj_ref, sup_ref, b_ref, o_ref):
    # adj_ref: (tile_n, tile_n)   compute dtype
    # sup_ref: (tile_n, F_out_p)  compute dtype (batch dim squeezed)
    # b_ref:   (1, F_out_p)       float32
    # o_ref:   (tile_n, F_out_p)  float32 (batch dim squeezed); same output
    #          block across the k axis -> VMEM-resident accumulator.
    k = pl.program_id(2)

    @pl.when(k == 0)
    def _init():
        o_ref[...] = jnp.broadcast_to(b_ref[...], o_ref.shape)

    o_ref[...] += jnp.dot(
        adj_ref[...], sup_ref[...], preferred_element_type=jnp.float32
    )


def graph_convolution(x, weight, adj, bias, *, compute_dtype=jnp.bfloat16, tile_n=128):
    """Pallas GCN forward: out = adj @ (x @ weight) + bias.

    x: [B, N, F_in] or [N, F_in]; adj: dense [N, N]; weight: [F_in, F_out];
    bias: [F_out].  Returns float32 [B, N, F_out] (or [N, F_out] for 2D input).

    tile_n: node tile for the adj matmul. 128 suits v5e (4x128^2 MXU); prefer
    256 on v6e/v7x (2x256^2 MXU) for large meshes.
    """
    squeeze = x.ndim == 2
    if squeeze:
        x = x[None]
    B, N, F_in = x.shape
    F_out = weight.shape[1]
    out_dtype = jnp.promote_types(x.dtype, weight.dtype)

    # Zero-pad to lane- / MXU-aligned shapes (cropped before returning).
    F_in_p = _round_up(F_in, _LANE)
    F_out_p = _round_up(F_out, _LANE)
    N_p = _round_up(N, tile_n)

    xp = jnp.pad(x, ((0, 0), (0, N_p - N), (0, F_in_p - F_in))).astype(compute_dtype)
    wp = jnp.pad(weight, ((0, F_in_p - F_in), (0, F_out_p - F_out))).astype(compute_dtype)
    adjp = jnp.pad(adj, ((0, N_p - N), (0, N_p - N))).astype(compute_dtype)
    biasp = jnp.pad(bias, (0, F_out_p - F_out)).astype(jnp.float32).reshape(1, F_out_p)

    # ---- Stage 1: support = X @ W with the batch hoisted into the row dim ----
    M_p = B * N_p
    x2d = xp.reshape(M_p, F_in_p)
    tm = max(t for t in (512, 256, 128) if M_p % t == 0)

    support = pl.pallas_call(
        _support_kernel,
        out_shape=jax.ShapeDtypeStruct((M_p, F_out_p), compute_dtype),
        grid_spec=pltpu.PrefetchScalarGridSpec(
            num_scalar_prefetch=0,
            grid=(M_p // tm,),
            in_specs=[
                pl.BlockSpec((tm, F_in_p), lambda i: (i, 0)),
                pl.BlockSpec((F_in_p, F_out_p), lambda i: (0, 0)),
            ],
            out_specs=pl.BlockSpec((tm, F_out_p), lambda i: (i, 0)),
        ),
        compiler_params=pltpu.CompilerParams(
            dimension_semantics=("parallel",),
            vmem_limit_bytes=_VMEM_LIMIT_BYTES,
        ),
    )(x2d, wp)
    support = support.reshape(B, N_p, F_out_p)

    # ---- Stage 2: out[b] = adj @ support[b] + bias, tiled over node blocks ----
    n_tiles = N_p // tile_n
    out_p = pl.pallas_call(
        _aggregate_kernel,
        out_shape=jax.ShapeDtypeStruct((B, N_p, F_out_p), jnp.float32),
        grid_spec=pltpu.PrefetchScalarGridSpec(
            num_scalar_prefetch=0,
            grid=(B, n_tiles, n_tiles),
            in_specs=[
                pl.BlockSpec((tile_n, tile_n), lambda b, i, k: (i, k)),
                pl.BlockSpec((pl.Squeezed(), tile_n, F_out_p),
                             lambda b, i, k: (b, k, 0)),
                pl.BlockSpec((1, F_out_p), lambda b, i, k: (0, 0)),
            ],
            out_specs=pl.BlockSpec((pl.Squeezed(), tile_n, F_out_p),
                                   lambda b, i, k: (b, i, 0)),
        ),
        compiler_params=pltpu.CompilerParams(
            dimension_semantics=("parallel", "parallel", "arbitrary"),
            vmem_limit_bytes=_VMEM_LIMIT_BYTES,
        ),
    )(adjp, support, biasp)

    out = out_p[:, :N, :F_out].astype(out_dtype)
    if squeeze:
        out = out[0]
    return out


def make_params(key, in_features, out_features, n_nodes):
    """Deterministic parameter / adjacency construction mirroring __init__."""
    stdv = 6.0 / math.sqrt(in_features + out_features)
    k_w, k_b = jax.random.split(key)
    weight = jax.random.uniform(
        k_w, (in_features, out_features), jnp.float32, minval=-stdv, maxval=stdv
    )
    bias = jax.random.uniform(
        k_b, (out_features,), jnp.float32, minval=-stdv, maxval=stdv
    )
    # Synthetic adjacency: ring graph with self-loops, row-normalized
    # (stands in for the sparse SMPL/MANO adjacency loaded from .pt files).
    i = jnp.arange(n_nodes)
    adj = (
        jnp.eye(n_nodes, dtype=jnp.float32)
        + jnp.eye(n_nodes, dtype=jnp.float32)[:, (i + 1) % n_nodes]
        + jnp.eye(n_nodes, dtype=jnp.float32)[:, (i - 1) % n_nodes]
    )
    adj = adj / jnp.sum(adj, axis=1, keepdims=True)
    return weight, bias, adj


if __name__ == "__main__":
    key = jax.random.PRNGKey(0)
    k_x, k_p = jax.random.split(key)

    B, N, F_in, F_out = 2, 16, 32, 32
    x = jax.random.normal(k_x, (B, N, F_in), jnp.float32)
    weight, bias, adj = make_params(k_p, F_in, F_out, N)

    # --- f32 compute path: exact semantic check against pure-JAX reference ---
    out_f32 = jax.block_until_ready(
        graph_convolution(x, weight, adj, bias, compute_dtype=jnp.float32)
    )
    ref_f32 = (
        jnp.einsum("nm,bmf->bnf", adj, jnp.einsum("bnf,fo->bno", x, weight)) + bias
    )
    assert out_f32.shape == (B, N, F_out)
    assert jnp.allclose(out_f32, ref_f32, atol=1e-4, rtol=1e-4)

    # --- bf16 compute path (default, MXU-friendly): check vs bf16 reference ---
    out_bf16 = jax.block_until_ready(graph_convolution(x, weight, adj, bias))
    xb = x.astype(jnp.bfloat16)
    wb = weight.astype(jnp.bfloat16)
    ab = adj.astype(jnp.bfloat16)
    sup_b = jnp.einsum(
        "bnf,fo->bno", xb, wb, preferred_element_type=jnp.float32
    ).astype(jnp.bfloat16)
    ref_bf16 = (
        jnp.einsum("nm,bmo->bno", ab, sup_b, preferred_element_type=jnp.float32)
        + bias
    )
    assert out_bf16.shape == (B, N, F_out)
    assert jnp.allclose(out_bf16, ref_bf16, atol=2e-3, rtol=2e-3)
    # Loose check against the full-f32 reference (bf16 operand precision).
    assert jnp.allclose(out_bf16, ref_f32, atol=5e-2, rtol=5e-2)

    # --- 2D path (single graph, no batch dim) ---
    out2d = jax.block_until_ready(
        graph_convolution(x[0], weight, adj, bias, compute_dtype=jnp.float32)
    )
    ref2d = adj @ (x[0] @ weight) + bias
    assert out2d.shape == (N, F_out)
    assert jnp.allclose(out2d, ref2d, atol=1e-4, rtol=1e-4)

    print("KERNEL_OK")
</pallas_src>

<mosaic_0001>
module attributes {stable_mosaic.version = 11 : i64} {
  func.func @_support_kernel(%arg0: i32, %arg1: memref<256x128xf32, #tpu.memory_space<vmem>>, %arg2: memref<128x128xf32, #tpu.memory_space<vmem>>, %arg3: memref<256x128xf32, #tpu.memory_space<vmem>>) attributes {dimension_semantics = [#tpu.dimension_semantics<parallel>], iteration_bounds = array<i64: 1>, scalar_prefetch = 0 : i64, scratch_operands = 0 : i64, tpu.core_type = #tpu.core_type<tc>, window_params = [{transform_indices = @transform_0, window_bounds = array<i64: 256, 128>}, {pipeline_mode = #tpu.pipeline_mode<synchronous>, transform_indices = @transform_1, window_bounds = array<i64: 128, 128>}, {transform_indices = @transform_2, window_bounds = array<i64: 256, 128>}]} {
    %c0 = arith.constant 0 : index
    %c0_0 = arith.constant 0 : index
    %0 = vector.load %arg1[%c0, %c0_0] : memref<256x128xf32, #tpu.memory_space<vmem>>, vector<256x128xf32>
    %c0_1 = arith.constant 0 : index
    %c0_2 = arith.constant 0 : index
    %1 = vector.load %arg2[%c0_1, %c0_2] : memref<128x128xf32, #tpu.memory_space<vmem>>, vector<128x128xf32>
    %cst = arith.constant dense<0.000000e+00> : vector<256x128xf32>
    %2 = tpu.matmul %0, %1, %cst {dimension_numbers = #tpu.dot_dimension_numbers<[1], [0], [0], [1], [0, 0, 1, 1], [], []>} : vector<256x128xf32>, vector<128x128xf32>, vector<256x128xf32> -> vector<256x128xf32>
    %c0_3 = arith.constant 0 : index
    %c0_4 = arith.constant 0 : index
    %3 = vector.load %arg3[%c0_3, %c0_4] : memref<256x128xf32, #tpu.memory_space<vmem>>, vector<256x128xf32>
    tpu.vector_store %arg3[%c0_3, %c0_4], %2 {strides = array<i32>} : memref<256x128xf32, #tpu.memory_space<vmem>>, vector<256x128xf32>,
    return
  }
  func.func @transform_0(%arg0: i32) -> (i32, i32) {
    %c0_i32 = arith.constant 0 : i32
    %c0_i32_0 = arith.constant 0 : i32
    return %arg0, %c0_i32 : i32, i32
  }
  func.func @transform_1(%arg0: i32) -> (i32, i32) {
    %c0_i32 = arith.constant 0 : i32
    %c0_i32_0 = arith.constant 0 : i32
    %c0_i32_1 = arith.constant 0 : i32
    return %c0_i32, %c0_i32_0 : i32, i32
  }
  func.func @transform_2(%arg0: i32) -> (i32, i32) {
    %c0_i32 = arith.constant 0 : i32
    %c0_i32_0 = arith.constant 0 : i32
    return %arg0, %c0_i32 : i32, i32
  }
}

</mosaic_0001>

<bundles_post_ra>
// kernel: tpu_custom_call.1
= control target key start
LH: loop header
LB: loop body
LE: loop exit
PB: predicated region body
PF: predicated region fallthrough
CT: control target
= control target key end

     0   :  { %7 = vsyncpa [#allocation3], 0  ;;  %s632_s0 = inlined_call_operand.hbm [shape: f32[256,128], index: 0, kind: input, shape index: {}]   ;;  %s633_s1 = inlined_call_operand.hbm [shape: f32[128,128], index: 1, kind: input, shape index: {}]   ;;  %s634_s2 = inlined_call_operand.hbm [shape: f32[256,128], index: 2, kind: output, shape index: {}]  }
   0x1   :  { %8 = vsyncpa [#allocation6], 0 }
   0x2   :  { %9 = vsyncpa [#allocation4], 0  ;;  %s594_s9 = smov [#allocation2]  }
   0x3   :  { %s15_s10 = sshll.u32 %s594_s9, 4  ;;  %s16_s10 = int_to_ptr.vmem [resolvable:$true] %s15_s10 }
   0x4   :  { %s536_s11 = scalar_lea.vmem %s16_s10, 4096  ;;  %p541_p1 = scmp.lt.s32.totalorder %s16_s10, %s16_s10 }
   0x5   :  { %p537_p0 = scmp.ne.s32.totalorder %s16_s10, %s536_s11  ;;  %p542_p2 = scmp.lt.s32.totalorder %s536_s11, %s536_s11 }
   0x7   :  { %p543_p3 = por %p542_p2, %p541_p1 }
   0x9   :  { %p544_p4 = pnand %p543_p3, %p537_p0 }
   0xb   :  { %547 = shalt.err (!%p544_p4)
}
   0xc   :  { %s595_s12 = smov 128   ;;  %s596_s13 = smov 8  }
   0xd   :  { %21 = dma.hbm_to_vmem [thread:$0]  %s632_s0, 4096, %s16_s10, [#allocation3], %s595_s12, %s595_s12, %s596_s13  }
   0xe   :  { %s597_s16 = smov [#allocation5]  }
   0xf   :  { %s27_s17 = sshll.u32 %s597_s16, 4  ;;  %s28_s17 = int_to_ptr.vmem [resolvable:$true] %s27_s17 }
  0x10   :  { %s556_s18 = scalar_lea.vmem %s28_s17, 2048  ;;  %p561_p6 = scmp.lt.s32.totalorder %s28_s17, %s28_s17 }
  0x11   :  { %p557_p5 = scmp.ne.s32.totalorder %s28_s17, %s556_s18  ;;  %p562_p7 = scmp.lt.s32.totalorder %s556_s18, %s556_s18 }
  0x13   :  { %p563_p8 = por %p562_p7, %p561_p6 }
  0x15   :  { %p564_p9 = pnand %p563_p8, %p557_p5 }
  0x17   :  { %567 = shalt.err (!%p564_p9)
}
  0x18   :  { %33 = dma.hbm_to_vmem [thread:$0]  %s633_s1, 2048, %s28_s17, [#allocation6], %s595_s12, %s595_s12, %s596_s13  }
  0x19   :  { %588 = dma.done.wait [#allocation3], 4096  }
  0x1a   :  { %589 = vsyncadd [#allocation3], 4294963200 }
  0x1b   :  { %590 = dma.done.wait [#allocation6], 2048  }
  0x1c   :  { %591 = vsyncadd [#allocation6], 4294965248  ;;  %v87_v0 = vld [vmem:[#allocation5 + $0x78] sm:$0xff]  ;;  %v86_v1 = vld [vmem:[#allocation5 + $0x70] sm:$0xff]  ;;  %s598_s0 = smov [#allocation7]  }
  0x1d   :  { %411 = vmatprep.subr.mxu0 %v87_v0  ;;  %491 = vmatprep.subr.mxu1 %v87_v0  ;;  %v85_v2 = vld [vmem:[#allocation5 + $0x68] sm:$0xff]  ;;  %v84_v3 = vld [vmem:[#allocation5 + $0x60] sm:$0xff]  ;;  %v83_v4 = vld [vmem:[#allocation5 + $0x58] sm:$0xff]  ;;  %s350_s1 = sshll.u32 %s598_s0, 4  ;;  %s351_s1 = int_to_ptr.vmem [resolvable:$true] %s350_s1 }
  0x1e   :  { %412 = vmatpush3.msra.mxu0 %v87_v0  ;;  %507 = vmatpush3.msra.mxu1 %v87_v0  ;;  %v82_v5 = vld [vmem:[#allocation5 + $0x50] sm:$0xff]  ;;  %v81_v6 = vld [vmem:[#allocation5 + $0x48] sm:$0xff]  ;;  %v80_v7 = vld [vmem:[#allocation5 + $0x40] sm:$0xff]  ;;  %s568_s21 = scalar_lea.vmem %s351_s1, 4096  ;;  %p573_p11 = scmp.lt.s32.totalorder %s351_s1, %s351_s1 }
  0x1f   :  { %413 = vmatprep.subr.mxu0 %v86_v1  ;;  %492 = vmatprep.subr.mxu1 %v86_v1  ;;  %v79_v8 = vld [vmem:[#allocation5 + $0x38] sm:$0xff]  ;;  %v78_v9 = vld [vmem:[#allocation5 + $0x30] sm:$0xff]  ;;  %v77_v10 = vld [vmem:[#allocation5 + $0x28] sm:$0xff]  ;;  %p569_p10 = scmp.ne.s32.totalorder %s351_s1, %s568_s21  ;;  %p574_p12 = scmp.lt.s32.totalorder %s568_s21, %s568_s21 }
  0x20   :  { %414 = vmatpush3.msra.mxu0 %v86_v1  ;;  %508 = vmatpush3.msra.mxu1 %v86_v1  ;;  %v76_v11 = vld [vmem:[#allocation5 + $0x20] sm:$0xff]  ;;  %v75_v12 = vld [vmem:[#allocation5 + $0x18] sm:$0xff]  ;;  %v74_v13 = vld [vmem:[#allocation5 + $0x10] sm:$0xff] }
  0x21   :  { %415 = vmatprep.subr.mxu0 %v85_v2  ;;  %493 = vmatprep.subr.mxu1 %v85_v2  ;;  %v73_v14 = vld [vmem:[#allocation5 + $0x8] sm:$0xff]  ;;  %v72_v15 = vld [vmem:[#allocation5] sm:$0xff]  ;;  %v42_v20 = vld [vmem:[#allocation2 + $0x10] sm:$0xff]  ;;  %p575_p13 = por %p574_p12, %p573_p11 }
  0x22   :  { %416 = vmatpush3.msra.mxu0 %v85_v2  ;;  %509 = vmatpush3.msra.mxu1 %v85_v2  ;;  %v40_v16 = vld [vmem:[#allocation2] sm:$0xff]  ;;  %v41_v18 = vld [vmem:[#allocation2 + $0x8] sm:$0xff]  ;;  %v58_v21 = vld [vmem:[#allocation2 + $0x90] sm:$0xff] }
  0x23   :  { %417 = vmatprep.subr.mxu0 %v84_v3  ;;  %494 = vmatprep.subr.mxu1 %v84_v3  ;;  %v56_v17 = vld [vmem:[#allocation2 + $0x80] sm:$0xff]  ;;  %v57_v19 = vld [vmem:[#allocation2 + $0x88] sm:$0xff]  ;;  %v43_v22 = vld [vmem:[#allocation2 + $0x18] sm:$0xff]  ;;  %p576_p0 = pnand %p575_p13, %p569_p10 }
  0x24   :  { %418 = vmatpush3.msra.mxu0 %v84_v3  ;;  %510 = vmatpush3.msra.mxu1 %v84_v3  ;;  %v59_v23 = vld [vmem:[#allocation2 + $0x98] sm:$0xff]  ;;  %v44_v24 = vld [vmem:[#allocation2 + $0x20] sm:$0xff]  ;;  %v45_v26 = vld [vmem:[#allocation2 + $0x28] sm:$0xff] }
  0x25   :  { %419 = vmatprep.subr.mxu0 %v83_v4  ;;  %495 = vmatprep.subr.mxu1 %v83_v4  ;;  %v60_v25 = vld [vmem:[#allocation2 + $0xa0] sm:$0xff]  ;;  %v61_v27 = vld [vmem:[#allocation2 + $0xa8] sm:$0xff]  ;;  %v46_v28 = vld [vmem:[#allocation2 + $0x30] sm:$0xff] }
  0x26   :  { %420 = vmatpush3.msra.mxu0 %v83_v4  ;;  %511 = vmatpush3.msra.mxu1 %v83_v4  ;;  %v62_v29 = vld [vmem:[#allocation2 + $0xb0] sm:$0xff]  ;;  %v47_v30 = vld [vmem:[#allocation2 + $0x38] sm:$0xff]  ;;  %v48_v32 = vld [vmem:[#allocation2 + $0x40] sm:$0xff] }
  0x27   :  { %421 = vmatprep.subr.mxu0 %v82_v5  ;;  %496 = vmatprep.subr.mxu1 %v82_v5  ;;  %v63_v31 = vld [vmem:[#allocation2 + $0xb8] sm:$0xff]  ;;  %v64_v33 = vld [vmem:[#allocation2 + $0xc0] sm:$0xff]  ;;  %v49_v34 = vld [vmem:[#allocation2 + $0x48] sm:$0xff] }
  0x28   :  { %422 = vmatpush3.msra.mxu0 %v82_v5  ;;  %512 = vmatpush3.msra.mxu1 %v82_v5  ;;  %v65_v35 = vld [vmem:[#allocation2 + $0xc8] sm:$0xff]  ;;  %v50_v36 = vld [vmem:[#allocation2 + $0x50] sm:$0xff]  ;;  %v51_v38 = vld [vmem:[#allocation2 + $0x58] sm:$0xff] }
  0x29   :  { %423 = vmatprep.subr.mxu0 %v81_v6  ;;  %497 = vmatprep.subr.mxu1 %v81_v6  ;;  %v66_v37 = vld [vmem:[#allocation2 + $0xd0] sm:$0xff]  ;;  %v67_v39 = vld [vmem:[#allocation2 + $0xd8] sm:$0xff]  ;;  %v52_v40 = vld [vmem:[#allocation2 + $0x60] sm:$0xff] }
  0x2a   :  { %424 = vmatpush3.msra.mxu0 %v81_v6  ;;  %513 = vmatpush3.msra.mxu1 %v81_v6  ;;  %v68_v41 = vld [vmem:[#allocation2 + $0xe0] sm:$0xff]  ;;  %v53_v42 = vld [vmem:[#allocation2 + $0x68] sm:$0xff]  ;;  %v54_v44 = vld [vmem:[#allocation2 + $0x70] sm:$0xff] }
  0x2b   :  { %425 = vmatprep.subr.mxu0 %v80_v7  ;;  %498 = vmatprep.subr.mxu1 %v80_v7  ;;  %v69_v43 = vld [vmem:[#allocation2 + $0xe8] sm:$0xff]  ;;  %v70_v45 = vld [vmem:[#allocation2 + $0xf0] sm:$0xff]  ;;  %v55_v46 = vld [vmem:[#allocation2 + $0x78] sm:$0xff] }
  0x2c   :  { %426 = vmatpush3.msra.mxu0 %v80_v7  ;;  %514 = vmatpush3.msra.mxu1 %v80_v7  ;;  %v71_v47 = vld [vmem:[#allocation2 + $0xf8] sm:$0xff] }
  0x2d   :  { %427 = vmatprep.subr.mxu0 %v79_v8  ;;  %499 = vmatprep.subr.mxu1 %v79_v8 }
  0x2e   :  { %428 = vmatpush3.msra.mxu0 %v79_v8  ;;  %515 = vmatpush3.msra.mxu1 %v79_v8 }
  0x2f   :  { %429 = vmatprep.subr.mxu0 %v78_v9  ;;  %500 = vmatprep.subr.mxu1 %v78_v9 }
  0x30   :  { %430 = vmatpush3.msra.mxu0 %v78_v9  ;;  %516 = vmatpush3.msra.mxu1 %v78_v9 }
  0x31   :  { %431 = vmatprep.subr.mxu0 %v77_v10  ;;  %501 = vmatprep.subr.mxu1 %v77_v10 }
  0x32   :  { %432 = vmatpush3.msra.mxu0 %v77_v10  ;;  %517 = vmatpush3.msra.mxu1 %v77_v10 }
  0x33   :  { %433 = vmatprep.subr.mxu0 %v76_v11  ;;  %502 = vmatprep.subr.mxu1 %v76_v11 }
  0x34   :  { %434 = vmatpush3.msra.mxu0 %v76_v11  ;;  %518 = vmatpush3.msra.mxu1 %v76_v11 }
  0x35   :  { %435 = vmatprep.subr.mxu0 %v75_v12  ;;  %503 = vmatprep.subr.mxu1 %v75_v12 }
  0x36   :  { %436 = vmatpush3.msra.mxu0 %v75_v12  ;;  %519 = vmatpush3.msra.mxu1 %v75_v12 }
  0x37   :  { %437 = vmatprep.subr.mxu0 %v74_v13  ;;  %504 = vmatprep.subr.mxu1 %v74_v13 }
  0x38   :  { %438 = vmatpush3.msra.mxu0 %v74_v13  ;;  %520 = vmatpush3.msra.mxu1 %v74_v13 }
  0x39   :  { %439 = vmatprep.subr.mxu0 %v73_v14  ;;  %505 = vmatprep.subr.mxu1 %v73_v14 }
  0x3a   :  { %440 = vmatpush3.msra.mxu0 %v73_v14  ;;  %521 = vmatpush3.msra.mxu1 %v73_v14 }
  0x3b   :  { %441 = vmatprep.subr.mxu0 %v72_v15  ;;  %506 = vmatprep.subr.mxu1 %v72_v15 }
  0x3c   :  { %442 = vmatpush3.msra.mxu0 %v72_v15  ;;  %522 = vmatpush3.msra.mxu1 %v72_v15 }
  0x3d   :  { %443 = vmatprep.mubr.f32.mxu0 %v40_v16  ;;  %467 = vmatprep.mubr.f32.mxu1 %v56_v17 }
  0x3e   :  { %444 = vmatmul.mubr.f32.vlgmr.msra.gmra.mxu0 %v41_v18  ;;  %468 = vmatmul.mubr.f32.vlgmr.msra.gmra.mxu1 %v57_v19 }
  0x3f   :  { %446 = vmatprep.mubr.f32.mxu0 %v42_v20  ;;  %470 = vmatprep.mubr.f32.mxu1 %v58_v21 }
  0x42   :  { %447 = vmatmul.mubr.f32.gmra.mxu0 %v43_v22  ;;  %471 = vmatmul.mubr.f32.gmra.mxu1 %v59_v23 }
  0x43   :  { %449 = vmatprep.mubr.f32.mxu0 %v44_v24  ;;  %473 = vmatprep.mubr.f32.mxu1 %v60_v25 }
  0x46   :  { %450 = vmatmul.mubr.f32.gmra.mxu0 %v45_v26  ;;  %474 = vmatmul.mubr.f32.gmra.mxu1 %v61_v27 }
  0x47   :  { %452 = vmatprep.mubr.f32.mxu0 %v46_v28  ;;  %476 = vmatprep.mubr.f32.mxu1 %v62_v29 }
  0x4a   :  { %453 = vmatmul.mubr.f32.gmra.mxu0 %v47_v30  ;;  %477 = vmatmul.mubr.f32.gmra.mxu1 %v63_v31 }
  0x4b   :  { %455 = vmatprep.mubr.f32.mxu0 %v48_v32  ;;  %479 = vmatprep.mubr.f32.mxu1 %v64_v33 }
  0x4e   :  { %456 = vmatmul.mubr.f32.gmra.mxu0 %v49_v34  ;;  %480 = vmatmul.mubr.f32.gmra.mxu1 %v65_v35 }
  0x4f   :  { %458 = vmatprep.mubr.f32.mxu0 %v50_v36  ;;  %482 = vmatprep.mubr.f32.mxu1 %v66_v37 }
  0x52   :  { %459 = vmatmul.mubr.f32.gmra.mxu0 %v51_v38  ;;  %483 = vmatmul.mubr.f32.gmra.mxu1 %v67_v39 }
  0x53   :  { %461 = vmatprep.mubr.f32.mxu0 %v52_v40  ;;  %485 = vmatprep.mubr.f32.mxu1 %v68_v41 }
  0x56   :  { %462 = vmatmul.mubr.f32.gmra.mxu0 %v53_v42  ;;  %486 = vmatmul.mubr.f32.gmra.mxu1 %v69_v43 }
  0x57   :  { %464 = vmatprep.mubr.f32.mxu0 %v54_v44  ;;  %488 = vmatprep.mubr.f32.mxu1 %v70_v45 }
  0x5a   :  { %465 = vmatmul.mubr.f32.gmra.mxu0 %v55_v46  ;;  %489 = vmatmul.mubr.f32.gmra.mxu1 %v71_v47 }
  0xfe   :  { %v445_v48 = vpop.f32.mrf.mxu0  ;;  %v469_v49 = vpop.f32.mrf.mxu1 }
  0xff   :  { %314 = vst [vmem:[#allocation7 + $0x8] sm:$0xff] %v445_v48  ;;  %330 = vst [vmem:[#allocation7 + $0x88] sm:$0xff] %v469_v49 }
 0x100   :  { %v154_v50 = vpop.f32.mrf.mxu0  ;;  %v234_v51 = vpop.f32.mrf.mxu1 }
 0x101   :  { %313 = vst [vmem:[#allocation7] sm:$0xff] %v154_v50  ;;  %329 = vst [vmem:[#allocation7 + $0x80] sm:$0xff] %v234_v51 }
 0x102   :  { %v448_v52 = vpop.f32.mrf.mxu0  ;;  %v472_v53 = vpop.f32.mrf.mxu1 }
 0x103   :  { %316 = vst [vmem:[#allocation7 + $0x18] sm:$0xff] %v448_v52  ;;  %332 = vst [vmem:[#allocation7 + $0x98] sm:$0xff] %v472_v53 }
 0x104   :  { %v164_v54 = vpop.f32.mrf.mxu0  ;;  %v244_v55 = vpop.f32.mrf.mxu1 }
 0x105   :  { %315 = vst [vmem:[#allocation7 + $0x10] sm:$0xff] %v164_v54  ;;  %331 = vst [vmem:[#allocation7 + $0x90] sm:$0xff] %v244_v55 }
 0x106   :  { %v451_v56 = vpop.f32.mrf.mxu0  ;;  %v475_v57 = vpop.f32.mrf.mxu1 }
 0x107   :  { %318 = vst [vmem:[#allocation7 + $0x28] sm:$0xff] %v451_v56  ;;  %334 = vst [vmem:[#allocation7 + $0xa8] sm:$0xff] %v475_v57 }
 0x108   :  { %v174_v58 = vpop.f32.mrf.mxu0  ;;  %v254_v59 = vpop.f32.mrf.mxu1 }
 0x109   :  { %317 = vst [vmem:[#allocation7 + $0x20] sm:$0xff] %v174_v58  ;;  %333 = vst [vmem:[#allocation7 + $0xa0] sm:$0xff] %v254_v59 }
 0x10a   :  { %v454_v60 = vpop.f32.mrf.mxu0  ;;  %v478_v61 = vpop.f32.mrf.mxu1 }
 0x10b   :  { %320 = vst [vmem:[#allocation7 + $0x38] sm:$0xff] %v454_v60  ;;  %336 = vst [vmem:[#allocation7 + $0xb8] sm:$0xff] %v478_v61 }
 0x10c   :  { %v184_v62 = vpop.f32.mrf.mxu0  ;;  %v264_v63 = vpop.f32.mrf.mxu1 }
 0x10d   :  { %319 = vst [vmem:[#allocation7 + $0x30] sm:$0xff] %v184_v62  ;;  %335 = vst [vmem:[#allocation7 + $0xb0] sm:$0xff] %v264_v63 }
 0x10e   :  { %v457_v0 = vpop.f32.mrf.mxu0  ;;  %v481_v1 = vpop.f32.mrf.mxu1 }
 0x10f   :  { %322 = vst [vmem:[#allocation7 + $0x48] sm:$0xff] %v457_v0  ;;  %338 = vst [vmem:[#allocation7 + $0xc8] sm:$0xff] %v481_v1 }
 0x110   :  { %v194_v2 = vpop.f32.mrf.mxu0  ;;  %v274_v3 = vpop.f32.mrf.mxu1 }
 0x111   :  { %321 = vst [vmem:[#allocation7 + $0x40] sm:$0xff] %v194_v2  ;;  %337 = vst [vmem:[#allocation7 + $0xc0] sm:$0xff] %v274_v3 }
 0x112   :  { %v460_v4 = vpop.f32.mrf.mxu0  ;;  %v484_v5 = vpop.f32.mrf.mxu1 }
 0x113   :  { %324 = vst [vmem:[#allocation7 + $0x58] sm:$0xff] %v460_v4  ;;  %340 = vst [vmem:[#allocation7 + $0xd8] sm:$0xff] %v484_v5 }
 0x114   :  { %v204_v6 = vpop.f32.mrf.mxu0  ;;  %v284_v7 = vpop.f32.mrf.mxu1 }
 0x115   :  { %323 = vst [vmem:[#allocation7 + $0x50] sm:$0xff] %v204_v6  ;;  %339 = vst [vmem:[#allocation7 + $0xd0] sm:$0xff] %v284_v7 }
 0x116   :  { %v463_v8 = vpop.f32.mrf.mxu0  ;;  %v487_v9 = vpop.f32.mrf.mxu1 }
 0x117   :  { %326 = vst [vmem:[#allocation7 + $0x68] sm:$0xff] %v463_v8  ;;  %342 = vst [vmem:[#allocation7 + $0xe8] sm:$0xff] %v487_v9 }
 0x118   :  { %v214_v10 = vpop.f32.mrf.mxu0  ;;  %v294_v11 = vpop.f32.mrf.mxu1 }
 0x119   :  { %325 = vst [vmem:[#allocation7 + $0x60] sm:$0xff] %v214_v10  ;;  %341 = vst [vmem:[#allocation7 + $0xe0] sm:$0xff] %v294_v11 }
 0x11a   :  { %v466_v12 = vpop.f32.mrf.mxu0  ;;  %v490_v13 = vpop.f32.mrf.mxu1 }
 0x11b   :  { %328 = vst [vmem:[#allocation7 + $0x78] sm:$0xff] %v466_v12  ;;  %344 = vst [vmem:[#allocation7 + $0xf8] sm:$0xff] %v490_v13 }
 0x11c   :  { %v224_v14 = vpop.f32.mrf.mxu0  ;;  %v304_v15 = vpop.f32.mrf.mxu1 }
 0x11d   :  { %327 = vst [vmem:[#allocation7 + $0x70] sm:$0xff] %v224_v14  ;;  %343 = vst [vmem:[#allocation7 + $0xf0] sm:$0xff] %v304_v15 }
 0x11e   :  { %579 = shalt.err (!%p576_p0)
}
 0x11f   :  { %356 = dma.vmem_to_hbm [thread:$0]  %s351_s1, 4096, %s634_s2, [#allocation4], %s595_s12, %s595_s12, %s596_s13  }
 0x120   :  { %592 = dma.done.wait [#allocation4], 4096  }
 0x121   :  { %593 = vsyncadd [#allocation4], 4294963200 }
 0x122   :  { %360 = vsyncpa [#allocation3], 1 }
 0x123   :  { %361 = vsyncpa [#allocation6], 1 }
 0x124   :  { %362 = vsyncpa [#allocation4], 1 }

</bundles_post_ra>
